<compile_context>
chip_gen: v5e
topology: v5e:2x2
jax: 0.10.0
libtpu: 0.0.40
codegen_flags: <defaults>
</compile_context>

<pallas_src>
import math

import jax
import jax.numpy as jnp
from jax.experimental import pallas as pl
from jax.experimental.pallas import tpu as pltpu


_TILE_BYTES_CAP = 8 * 1024 * 1024       # per-block cap; 4 live buffers -> <= 32 MiB
_VMEM_LIMIT_BYTES = 48 * 1024 * 1024    # explicit, below v7x 64 MiB physical VMEM
_SMALL_FALLBACK_BYTES = 8 * 1024 * 1024 # single-block path only for small tensors


def _copy_kernel(x_ref, o_ref):
    # Identity copy of the current lane-dense tile; the reshape itself is pure
    # metadata and is applied with zero-cost jnp.reshape in the wrapper.
    o_ref[...] = x_ref[...]


def _resolve_outer_shape(outer_shape, n):
    """torch .view() semantics for the trailing dims, including a single -1."""
    outer = list(outer_shape)
    neg = [i for i, d in enumerate(outer) if d == -1]
    if len(neg) > 1:
        raise ValueError("only one -1 is allowed in outer_shape")
    if neg:
        known = math.prod(d for d in outer if d != -1)
        if known == 0 or n % known != 0:
            raise ValueError(f"cannot infer -1: {n} elements not divisible by {known}")
        outer[neg[0]] = n // known
    if math.prod(outer) != n:
        raise ValueError("outer_shape incompatible with input size")
    return tuple(outer)


def _sublane_multiple(dtype):
    # f32 -> 8, bf16/f16 -> 16, int8/fp8 -> 32 (keeps packed vregs full).
    itemsize = jnp.dtype(dtype).itemsize
    return max(8, 32 // max(itemsize, 1))


def _pick_slab(total, dtype):
    """Pick a lane-dense (rows, cols) factorization of `total` plus a row tile."""
    sub = _sublane_multiple(dtype)
    itemsize = jnp.dtype(dtype).itemsize
    for cols in (4096, 2048, 1024, 512, 256, 128):
        if total % cols != 0:
            continue
        rows = total // cols
        if rows % sub != 0:
            continue
        # Largest row tile that is a multiple of the sublane quantum, divides
        # `rows` exactly, and keeps the block under the per-tile byte cap.
        max_rows = max(sub, (_TILE_BYTES_CAP // (cols * itemsize)) // sub * sub)
        tile_rows = sub
        k = min(rows, max_rows) // sub
        while k >= 1:
            cand = k * sub
            if rows % cand == 0:
                tile_rows = cand
                break
            k -= 1
        return rows, cols, tile_rows
    return None


def reshape_forward(x, outer_shape):
    """Equivalent of torch `x.view(x.size(0), *outer_shape)` (materialized copy)."""
    b = x.shape[0]
    n = math.prod(x.shape[1:]) if x.ndim > 1 else 1
    outer = _resolve_outer_shape(outer_shape, n)
    out_shape = (b, *outer)
    total = b * n

    slab = _pick_slab(total, x.dtype)
    if slab is None:
        # Element count not 128-aligned: a single block equal to the full array
        # extent is always layout-legal; use it only for small tensors.
        nbytes = total * jnp.dtype(x.dtype).itemsize
        if nbytes > _SMALL_FALLBACK_BYTES:
            # TODO(synk): no aligned slab factorization for large unaligned
            # inputs; fall back to the metadata-only reshape instead of a copy.
            return jnp.reshape(x, out_shape)
        x2d = jnp.reshape(x, (b, n))
        out2d = pl.pallas_call(
            _copy_kernel,
            out_shape=jax.ShapeDtypeStruct((b, n), x.dtype),
            grid=(1,),
            in_specs=[pl.BlockSpec((b, n), lambda i: (0, 0))],
            out_specs=pl.BlockSpec((b, n), lambda i: (0, 0)),
            compiler_params=pltpu.CompilerParams(
                vmem_limit_bytes=_VMEM_LIMIT_BYTES,
            ),
        )(x2d)
        return jnp.reshape(out2d, out_shape)

    rows, cols, tile_rows = slab
    x2d = jnp.reshape(x, (rows, cols))  # row-major, zero-cost metadata change

    out2d = pl.pallas_call(
        _copy_kernel,
        out_shape=jax.ShapeDtypeStruct((rows, cols), x.dtype),
        grid_spec=pltpu.PrefetchScalarGridSpec(
            num_scalar_prefetch=0,
            grid=(rows // tile_rows,),
            in_specs=[pl.BlockSpec((tile_rows, cols), lambda i: (i, 0))],
            out_specs=pl.BlockSpec((tile_rows, cols), lambda i: (i, 0)),
        ),
        compiler_params=pltpu.CompilerParams(
            dimension_semantics=("parallel",),   # shards row tiles across TCs
            vmem_limit_bytes=_VMEM_LIMIT_BYTES,
        ),
    )(x2d)

    return jnp.reshape(out2d, out_shape)


if __name__ == "__main__":
    key = jax.random.PRNGKey(0)
    # Small NCHW input consistent with a conv-net reshape site in the VAE.
    B, C, H, W = 2, 4, 16, 16
    x = jax.random.normal(key, (B, C, H, W), dtype=jnp.float32)

    # Mirrors e.g. Reshape((C, H * W)): (B, C, H, W) -> (B, C, H*W)
    outer_shape = (C, H * W)

    out = reshape_forward(x, outer_shape)
    out = jax.block_until_ready(out)

    # Correctness check against plain JAX reshape (== torch .view semantics).
    ref = jnp.reshape(x, (B, *outer_shape))
    assert out.shape == (B, C, H * W)
    assert out.dtype == x.dtype
    assert bool(jnp.array_equal(out, ref))

    # Also exercise the -1 inference branch (torch allows -1 in view dims).
    out2 = jax.block_until_ready(reshape_forward(x, (C, -1)))
    assert out2.shape == (B, C, H * W)
    assert bool(jnp.array_equal(out2, ref))

    print("KERNEL_OK")
</pallas_src>

<mosaic_0001>
module attributes {stable_mosaic.version = 11 : i64} {
  func.func @_copy_kernel(%arg0: i32, %arg1: memref<8x256xf32, #tpu.memory_space<vmem>>, %arg2: memref<8x256xf32, #tpu.memory_space<vmem>>) attributes {dimension_semantics = [#tpu.dimension_semantics<parallel>], iteration_bounds = array<i64: 1>, scalar_prefetch = 0 : i64, scratch_operands = 0 : i64, tpu.core_type = #tpu.core_type<tc>, window_params = [{transform_indices = @transform_0, window_bounds = array<i64: 8, 256>}, {transform_indices = @transform_1, window_bounds = array<i64: 8, 256>}]} {
    %c0 = arith.constant 0 : index
    %c0_0 = arith.constant 0 : index
    %0 = vector.load %arg1[%c0, %c0_0] : memref<8x256xf32, #tpu.memory_space<vmem>>, vector<8x256xf32>
    %c0_1 = arith.constant 0 : index
    %c0_2 = arith.constant 0 : index
    %1 = vector.load %arg2[%c0_1, %c0_2] : memref<8x256xf32, #tpu.memory_space<vmem>>, vector<8x256xf32>
    tpu.vector_store %arg2[%c0_1, %c0_2], %0 {strides = array<i32>} : memref<8x256xf32, #tpu.memory_space<vmem>>, vector<8x256xf32>,
    return
  }
  func.func @transform_0(%arg0: i32) -> (i32, i32) {
    %c0_i32 = arith.constant 0 : i32
    %c0_i32_0 = arith.constant 0 : i32
    return %arg0, %c0_i32 : i32, i32
  }
  func.func @transform_1(%arg0: i32) -> (i32, i32) {
    %c0_i32 = arith.constant 0 : i32
    %c0_i32_0 = arith.constant 0 : i32
    return %arg0, %c0_i32 : i32, i32
  }
}

</mosaic_0001>

<bundles_post_ra>
// kernel: tpu_custom_call.1
= control target key start
LH: loop header
LB: loop body
LE: loop exit
PB: predicated region body
PF: predicated region fallthrough
CT: control target
= control target key end

     0   :  { %6 = vsyncpa [#allocation3], 0  ;;  %s116_s0 = inlined_call_operand.hbm [shape: f32[8,256], index: 0, kind: input, shape index: {}]   ;;  %s117_s1 = inlined_call_operand.hbm [shape: f32[8,256], index: 1, kind: output, shape index: {}]  }
   0x1   :  { %7 = vsyncpa [#allocation4], 0  ;;  %s13_s8 = sshll.u32 %s116_s0, 4  ;;  %s98_s9 = smov [#allocation2]   ;;  %s14_s8 = int_to_ptr.hbm [resolvable:$true] %s13_s8 }
   0x2   :  { %s15_s10 = sshll.u32 %s98_s9, 4  ;;  %s16_s10 = int_to_ptr.vmem [resolvable:$true] %s15_s10 }
   0x3   :  { %18 = dma.hbm_to_vmem [thread:$0]  %s14_s8, 256, %s16_s10, [#allocation3]  }
   0x4   :  { %94 = dma.done.wait [#allocation3], 256  }
   0x5   :  { %95 = vsyncadd [#allocation3], 4294967040  ;;  %s99_s11 = smov [#allocation5]   ;;  %s34_s15 = sshll.u32 %s117_s1, 4  ;;  %v23_v0 = vld [vmem:[#allocation2] sm:$0xff]  ;;  %v24_v1 = vld [vmem:[#allocation2 + $0x8] sm:$0xff]  ;;  %s35_s15 = int_to_ptr.hbm [resolvable:$true] %s34_s15 }
   0x6   :  { %s32_s12 = sshll.u32 %s99_s11, 4  ;;  %25 = vst [vmem:[#allocation5] sm:$0xff] %v23_v0  ;;  %s33_s12 = int_to_ptr.vmem [resolvable:$true] %s32_s12 }
   0x7   :  { %26 = vst [vmem:[#allocation5 + $0x8] sm:$0xff] %v24_v1 }
   0x8   :  { %37 = dma.vmem_to_hbm [thread:$0]  %s33_s12, 256, %s35_s15, [#allocation4]  }
   0x9   :  { %96 = dma.done.wait [#allocation4], 256  }
   0xa   :  { %97 = vsyncadd [#allocation4], 4294967040 }
   0xb   :  { %42 = vsyncpa [#allocation3], 1 }
   0xc   :  { %43 = vsyncpa [#allocation4], 1 }

</bundles_post_ra>
